<compile_context>
chip_gen: v7x
topology: tpu7x:2x2x1
jax: 0.10.0
libtpu: 0.0.40
codegen_flags: <defaults>
</compile_context>

<pallas_src>
import functools

import jax
import jax.numpy as jnp
from jax.experimental import pallas as pl
from jax.experimental.pallas import tpu as pltpu

# "-inf" stand-in for the implicit max_pool2d padding.  Safe because torch
# requires padding <= kernel_size/2, so every window holds >= 1 real element.
_SENTINEL = -(2 ** 30)


def _qmaxpool2d_kernel(x_ref, o_ref, cmax_ref, *pad_scratch, k, s, oh, ow, pad):
    # x_ref:    (1, hb, wb, cb) int32 fixed-point input tile (NHWC)
    # o_ref:    (1, oh, ow, cb) int32 output tile
    # cmax_ref: (1, hb+2p, wb+2p-k+1, cb) scratch: column (W-direction) max
    # pad_scratch: ((1, hb+2p, wb+2p, cb),) sentinel-padded copy, only if pad>0
    if pad > 0:
        xp_ref, = pad_scratch
        hb, wb = x_ref.shape[1], x_ref.shape[2]
        xp_ref[...] = jnp.full(xp_ref.shape, _SENTINEL, dtype=jnp.int32)
        xp_ref[:, pl.ds(pad, hb), pl.ds(pad, wb), :] = x_ref[...]
        src = xp_ref
    else:
        src = x_ref

    wv = cmax_ref.shape[2]  # = padded_w - k + 1

    # Stage 1: integer max over the k W offsets using unstrided, offset-only
    # sublane slices (shifts land on the otherwise-idle XLU slot).
    cmax = src[:, :, pl.ds(0, wv), :]
    for dj in range(1, k):
        cmax = jnp.maximum(cmax, src[:, :, pl.ds(dj, wv), :])
    cmax_ref[...] = cmax

    # Stage 2: one stride-s sublane subselect per H offset (k strided reads
    # instead of k*k) and integer max over the k H offsets.
    acc = cmax_ref[:, pl.ds(0, oh, s), pl.ds(0, ow, s), :]
    for di in range(1, k):
        acc = jnp.maximum(acc, cmax_ref[:, pl.ds(di, oh, s), pl.ds(0, ow, s), :])
    o_ref[...] = acc


def _largest_divisor_leq(n, cap):
    for d in range(min(n, cap), 0, -1):
        if n % d == 0:
            return d
    return 1


def qmaxpool2d_p(x_nchw, kernel_size, stride=None, padding=0, bits=8):
    """Forward pass of QMaxPool2dP. x_nchw: integer fixed-point tensor (NCHW).

    `bits` only sets the (cancelled) dequant/requant scale; the integer
    max-pool result is independent of it. Kept for API parity with the module.
    Output is int32 (values fit in `bits` bits; numerically identical to
    torch's LongTensor result without doubling writeback bytes).
    """
    del bits
    if stride is None:
        stride = kernel_size
    k, s, p = int(kernel_size), int(stride), int(padding)

    n, c, h, w = x_nchw.shape
    oh = (h + 2 * p - k) // s + 1
    ow = (w + 2 * p - k) // s + 1

    # Layout: NCHW -> NHWC so channels sit on lanes and all pooling strides hit
    # sublanes / leading dims.
    # TODO(synk): carry NHWC through the surrounding graph (or use a
    # transposing manual DMA) so this layout change doesn't cost an HBM pass.
    x = jnp.transpose(x_nchw.astype(jnp.int32), (0, 2, 3, 1))

    # Channel (lane) tiling: keep lanes dense for wide activations and bound
    # per-block VMEM (v7x has only 64 MiB).
    if c % 256 == 0:
        cb = 256
    elif c % 128 == 0:
        cb = 128
    else:
        cb = c

    # Output-row tiling (only when pooling windows don't overlap and there is
    # no padding, so row blocks map to disjoint input-row blocks).
    row_tiled = (p == 0 and s == k)
    if row_tiled:
        row_cap = max(1, (4 << 20) // (4 * k * w * cb))   # ~4 MiB input blocks
        toh = _largest_divisor_leq(oh, row_cap)
        hb, n_row = toh * k, oh // toh
    else:
        toh, hb, n_row = oh, h, 1

    hp, wp = hb + 2 * p, w + 2 * p
    wv = wp - k + 1

    scratch_shapes = [pltpu.VMEM((1, hp, wv, cb), jnp.int32)]
    if p > 0:
        scratch_shapes.append(pltpu.VMEM((1, hp, wp, cb), jnp.int32))

    # Explicit scoped-VMEM budget (defaults are 16/32 MiB, well below physical).
    blk_bytes = 4 * cb * (2 * hb * w + 2 * toh * ow + hp * wv
                          + (hp * wp if p > 0 else 0))
    vmem_limit = int(min(64 << 20, max(32 << 20, 2 * blk_bytes + (8 << 20))))

    kernel = functools.partial(
        _qmaxpool2d_kernel, k=k, s=s, oh=toh, ow=ow, pad=p)

    out_nhwc = pl.pallas_call(
        kernel,
        out_shape=jax.ShapeDtypeStruct((n, oh, ow, c), jnp.int32),
        grid=(n, c // cb, n_row),
        in_specs=[pl.BlockSpec((1, hb, w, cb), lambda i, j, r: (i, r, 0, j))],
        out_specs=pl.BlockSpec((1, toh, ow, cb), lambda i, j, r: (i, r, 0, j)),
        scratch_shapes=scratch_shapes,
        compiler_params=pltpu.CompilerParams(
            dimension_semantics=("parallel", "parallel", "parallel"),
            vmem_limit_bytes=vmem_limit,
        ),
    )(x)

    # NHWC -> NCHW.
    return jnp.transpose(out_nhwc, (0, 3, 1, 2))


def _reference(x_nchw, kernel_size, stride, padding, bits):
    # Pure-JAX mirror of the torch float path: dequant -> max_pool2d -> requant.
    scale = 2.0 ** (bits - 1)
    xf = x_nchw.astype(jnp.float32) / scale
    if padding > 0:
        xf = jnp.pad(
            xf, ((0, 0), (0, 0), (padding, padding), (padding, padding)),
            constant_values=-jnp.inf,
        )
    pooled = jax.lax.reduce_window(
        xf, -jnp.inf, jax.lax.max,
        (1, 1, kernel_size, kernel_size), (1, 1, stride, stride), "VALID",
    )
    return jnp.round(pooled * scale).astype(jnp.int32)


if __name__ == "__main__":
    key = jax.random.PRNGKey(0)
    # int8-range fixed-point inputs, NCHW.
    x = jax.random.randint(key, (2, 4, 16, 16), -128, 128, dtype=jnp.int32)

    kernel_size, stride, padding, bits = 2, 2, 0, 8
    out = qmaxpool2d_p(x, kernel_size, stride, padding, bits)
    out = jax.block_until_ready(out)

    ref = _reference(x, kernel_size, stride, padding, bits)
    assert out.shape == (2, 4, 8, 8) and out.dtype == jnp.int32
    assert bool(jnp.all(out == ref))

    print("KERNEL_OK")
</pallas_src>

<mosaic_0001>
module attributes {stable_mosaic.version = 11 : i64} {
  func.func @_qmaxpool2d_kernel(%arg0: i32, %arg1: i32, %arg2: i32, %arg3: memref<1x16x16x4xi32, #tpu.memory_space<vmem>>, %arg4: memref<1x8x8x4xi32, #tpu.memory_space<vmem>>, %arg5: memref<1x16x15x4xi32, #tpu.memory_space<vmem>>) attributes {dimension_semantics = [#tpu.dimension_semantics<parallel>, #tpu.dimension_semantics<parallel>, #tpu.dimension_semantics<parallel>], iteration_bounds = array<i64: 2, 1, 1>, scalar_prefetch = 0 : i64, scratch_operands = 1 : i64, tpu.core_type = #tpu.core_type<tc>, window_params = [{transform_indices = @transform_0, window_bounds = array<i64: 1, 16, 16, 4>}, {transform_indices = @transform_1, window_bounds = array<i64: 1, 8, 8, 4>}]} {
    %c0 = arith.constant 0 : index
    %c0_0 = arith.constant 0 : index
    %c0_1 = arith.constant 0 : index
    %c0_2 = arith.constant 0 : index
    %0 = vector.load %arg3[%c0, %c0_0, %c0_1, %c0_2] : memref<1x16x16x4xi32, #tpu.memory_space<vmem>>, vector<1x16x15x4xi32>
    %c0_3 = arith.constant 0 : index
    %c0_4 = arith.constant 0 : index
    %c1 = arith.constant 1 : index
    %c0_5 = arith.constant 0 : index
    %1 = vector.load %arg3[%c0_3, %c0_4, %c1, %c0_5] : memref<1x16x16x4xi32, #tpu.memory_space<vmem>>, vector<1x16x15x4xi32>
    %2 = arith.maxsi %0, %1 : vector<1x16x15x4xi32>
    %c0_6 = arith.constant 0 : index
    %c0_7 = arith.constant 0 : index
    %c0_8 = arith.constant 0 : index
    %c0_9 = arith.constant 0 : index
    %3 = vector.load %arg5[%c0_6, %c0_7, %c0_8, %c0_9] : memref<1x16x15x4xi32, #tpu.memory_space<vmem>>, vector<1x16x15x4xi32>
    tpu.vector_store %arg5[%c0_6, %c0_7, %c0_8, %c0_9], %2 {strides = array<i32>} : memref<1x16x15x4xi32, #tpu.memory_space<vmem>>, vector<1x16x15x4xi32>,
    %c0_10 = arith.constant 0 : index
    %c0_11 = arith.constant 0 : index
    %c0_12 = arith.constant 0 : index
    %c0_13 = arith.constant 0 : index
    %4 = tpu.strided_load %arg5[%c0_10, %c0_11, %c0_12, %c0_13] {strides = array<i32: 1, 2, 2, 1>} : memref<1x16x15x4xi32, #tpu.memory_space<vmem>>, vector<1x8x8x4xi32>
    %c0_14 = arith.constant 0 : index
    %c1_15 = arith.constant 1 : index
    %c0_16 = arith.constant 0 : index
    %c0_17 = arith.constant 0 : index
    %5 = tpu.strided_load %arg5[%c0_14, %c1_15, %c0_16, %c0_17] {strides = array<i32: 1, 2, 2, 1>} : memref<1x16x15x4xi32, #tpu.memory_space<vmem>>, vector<1x8x8x4xi32>
    %6 = arith.maxsi %4, %5 : vector<1x8x8x4xi32>
    %c0_18 = arith.constant 0 : index
    %c0_19 = arith.constant 0 : index
    %c0_20 = arith.constant 0 : index
    %c0_21 = arith.constant 0 : index
    %7 = vector.load %arg4[%c0_18, %c0_19, %c0_20, %c0_21] : memref<1x8x8x4xi32, #tpu.memory_space<vmem>>, vector<1x8x8x4xi32>
    tpu.vector_store %arg4[%c0_18, %c0_19, %c0_20, %c0_21], %6 {strides = array<i32>} : memref<1x8x8x4xi32, #tpu.memory_space<vmem>>, vector<1x8x8x4xi32>,
    return
  }
  func.func @transform_0(%arg0: i32, %arg1: i32, %arg2: i32) -> (i32, i32, i32, i32) {
    %c0_i32 = arith.constant 0 : i32
    %c0_i32_0 = arith.constant 0 : i32
    return %arg0, %arg2, %c0_i32, %arg1 : i32, i32, i32, i32
  }
  func.func @transform_1(%arg0: i32, %arg1: i32, %arg2: i32) -> (i32, i32, i32, i32) {
    %c0_i32 = arith.constant 0 : i32
    %c0_i32_0 = arith.constant 0 : i32
    return %arg0, %arg2, %c0_i32, %arg1 : i32, i32, i32, i32
  }
}

</mosaic_0001>

<bundles_post_ra>
// kernel: tpu_custom_call.1
= control target key start
LH: loop header
LB: loop body
LE: loop exit
PB: predicated region body
PF: predicated region fallthrough
CT: control target
= control target key end

     0   :  { %s586_s6 = smov 0   ;;  %s588_s7 = smov 0   ;;  %s739_s0 = inlined_call_operand.vmem [shape: s32[2,16,16,4], index: 0, kind: input, shape index: {}]   ;;  %s740_s1 = inlined_call_operand.vmem [shape: s32[2,8,8,4], index: 1, kind: output, shape index: {}]  }
   0x1   :  { %s590_s8 = smov 0  }
   0x2 LB: > { %s30_s9 = sadd.s32 1, %s570_s7  ;;  %p519_p0 = scmp.ge.s32.totalorder %s574_s8, 1  ;;  %s574_s8 = sphi %s590_s8, %s11_s8   ;;  %s570_s7 = sphi %s588_s7, %s742_s7   ;;  %s566_s6 = sphi %s586_s6, %s741_s6  }
   0x3   : > { %p32_p1 = scmp.ge.s32.totalorder %s30_s9, 2  ;;  %p123_p2 = scmp.lt.s32.totalorder %s574_s8, 3 }
   0x5   : > { %s744_s9 = smov (%p32_p1, %s30_s9), 0  ;;  %p124_p3 = pnand %p519_p0, %p123_p2 }
   0x6   : > { %p159_p4 = scmp.lt.s32.totalorder (!%p124_p3), %s566_s6, 1  ;;  %vm313_vm0 = vcmask (!%p124_p3), 31744   ;;  %vm315_vm2 = vcmask (!%p124_p3), 30720  }
   0x7   : > { %127 = sbr.rel (%p124_p3) target bundleno = 55 (0x37), region = 24 }
   0xe   : > { %s746_s6 = smov (!%p159_p4, %s566_s6), 1 }
   0xf   : > { %s526_s10 = sshll.u32 %s746_s6, 8  ;;  %s527_s14 = sshll.u32 %s746_s6, 6 }
  0x10   : > { %s610_s13 = scalar_lea.vmem %s739_s0, %s526_s10  ;;  %s708_s17 = scalar_lea.vmem %s740_s1, %s527_s14 }
  0x11   : > { %v185_v0 = vld [vmem:[%s610_s13] sm:$0xff]  ;;  %v186_v2 = vld [vmem:[%s610_s13 + $0x8] sm:$0x7f]  ;;  %v187_v4 = vld [vmem:[%s610_s13 + $0x10] sm:$0xff] }
  0x12   : > { %v217_v1 = vld [vmem:[%s610_s13 + $0x1] sm:$0xff]  ;;  %v218_v3 = vld [vmem:[%s610_s13 + $0x9] sm:$0x7f]  ;;  %v219_v5 = vld [vmem:[%s610_s13 + $0x11] sm:$0xff] }
  0x13   : > { %vm249_vm1 = vcmp.gt.s32.totalorder %v185_v0, %v217_v1  ;;  %vm251_vm3 = vcmp.gt.s32.totalorder %v186_v2, %v218_v3  ;;  %vm253_vm4 = vcmp.gt.s32.totalorder %v187_v4, %v219_v5  ;;  %v188_v7 = vld [vmem:[%s610_s13 + $0x18] sm:$0x7f]  ;;  %v189_v9 = vld [vmem:[%s610_s13 + $0x20] sm:$0xff]  ;;  %v190_v13 = vld [vmem:[%s610_s13 + $0x28] sm:$0x7f] }
  0x14   : > { %v250_v6 = vsel %vm249_vm1, %v185_v0, %v217_v1  ;;  %v220_v8 = vld [vmem:[%s610_s13 + $0x19] sm:$0x7f]  ;;  %v252_v10 = vsel %vm251_vm3, %v186_v2, %v218_v3  ;;  %v254_v11 = vsel %vm253_vm4, %v187_v4, %v219_v5  ;;  %v221_v12 = vld [vmem:[%s610_s13 + $0x21] sm:$0xff]  ;;  %v222_v14 = vld [vmem:[%s610_s13 + $0x29] sm:$0x7f] }
  0x15   : > { %314 = vst.msk [vmem:[#allocation2] sm:$0xff] %vm313_vm0, %v250_v6  ;;  %vm255_vm5 = vcmp.gt.s32.totalorder %v188_v7, %v220_v8  ;;  %317 = vst.msk [vmem:[#allocation2 + $0x10] sm:$0xff] %vm313_vm0, %v254_v11  ;;  %vm257_vm6 = vcmp.gt.s32.totalorder %v189_v9, %v221_v12  ;;  %vm259_vm7 = vcmp.gt.s32.totalorder %v190_v13, %v222_v14  ;;  %v191_v16 = vld [vmem:[%s610_s13 + $0x30] sm:$0xff]  ;;  %v192_v18 = vld [vmem:[%s610_s13 + $0x38] sm:$0x7f] }
  0x16   : > { %316 = vst.msk [vmem:[#allocation2 + $0x8] sm:$0x7f] %vm315_vm2, %v252_v10  ;;  %v256_v15 = vsel %vm255_vm5, %v188_v7, %v220_v8  ;;  %v223_v17 = vld [vmem:[%s610_s13 + $0x31] sm:$0xff]  ;;  %v258_v19 = vsel %vm257_vm6, %v189_v9, %v221_v12  ;;  %v260_v20 = vsel %vm259_vm7, %v190_v13, %v222_v14  ;;  %v224_v21 = vld [vmem:[%s610_s13 + $0x39] sm:$0x7f]  ;;  %v193_v22 = vld [vmem:[%s610_s13 + $0x40] sm:$0xff] }
  0x17   : > { %318 = vst.msk [vmem:[#allocation2 + $0x18] sm:$0x7f] %vm315_vm2, %v256_v15  ;;  %vm261_vm8 = vcmp.gt.s32.totalorder %v191_v16, %v223_v17  ;;  %v225_v23 = vld [vmem:[%s610_s13 + $0x41] sm:$0xff]  ;;  %320 = vst.msk [vmem:[#allocation2 + $0x28] sm:$0x7f] %vm315_vm2, %v260_v20  ;;  %vm263_vm9 = vcmp.gt.s32.totalorder %v192_v18, %v224_v21  ;;  %v195_v27 = vld [vmem:[%s610_s13 + $0x50] sm:$0xff] }
  0x18   : > { %319 = vst.msk [vmem:[#allocation2 + $0x20] sm:$0xff] %vm313_vm0, %v258_v19  ;;  %v262_v24 = vsel %vm261_vm8, %v191_v16, %v223_v17  ;;  %vm265_vm10 = vcmp.gt.s32.totalorder %v193_v22, %v225_v23  ;;  %v194_v25 = vld [vmem:[%s610_s13 + $0x48] sm:$0x7f]  ;;  %v264_v28 = vsel %vm263_vm9, %v192_v18, %v224_v21  ;;  %v227_v30 = vld [vmem:[%s610_s13 + $0x51] sm:$0xff]  ;;  %v228_v32 = vld [vmem:[%s610_s13 + $0x59] sm:$0x7f] }
  0x19   : > { %v226_v26 = vld [vmem:[%s610_s13 + $0x49] sm:$0x7f]  ;;  %321 = vst.msk [vmem:[#allocation2 + $0x30] sm:$0xff] %vm313_vm0, %v262_v24  ;;  %v266_v29 = vsel %vm265_vm10, %v193_v22, %v225_v23  ;;  %v196_v31 = vld [vmem:[%s610_s13 + $0x58] sm:$0x7f]  ;;  %vm269_vm12 = vcmp.gt.s32.totalorder %v195_v27, %v227_v30  ;;  %v197_v34 = vld [vmem:[%s610_s13 + $0x60] sm:$0xff] }
  0x1a   : > { %vm267_vm11 = vcmp.gt.s32.totalorder %v194_v25, %v226_v26  ;;  %322 = vst.msk [vmem:[#allocation2 + $0x38] sm:$0x7f] %vm315_vm2, %v264_v28  ;;  %vm271_vm13 = vcmp.gt.s32.totalorder %v196_v31, %v228_v32  ;;  %v229_v35 = vld [vmem:[%s610_s13 + $0x61] sm:$0xff]  ;;  %v270_v37 = vsel %vm269_vm12, %v195_v27, %v227_v30  ;;  %v230_v39 = vld [vmem:[%s610_s13 + $0x69] sm:$0x7f]  ;;  %v199_v40 = vld [vmem:[%s610_s13 + $0x70] sm:$0xff] }
  0x1b   : > { %323 = vst.msk [vmem:[#allocation2 + $0x40] sm:$0xff] %vm313_vm0, %v266_v29  ;;  %v268_v33 = vsel %vm267_vm11, %v194_v25, %v226_v26  ;;  %v198_v36 = vld [vmem:[%s610_s13 + $0x68] sm:$0x7f]  ;;  %v272_v38 = vsel %vm271_vm13, %v196_v31, %v228_v32  ;;  %vm273_vm14 = vcmp.gt.s32.totalorder %v197_v34, %v229_v35  ;;  %v231_v41 = vld [vmem:[%s610_s13 + $0x71] sm:$0xff]  ;;  %325 = vst.msk [vmem:[#allocation2 + $0x50] sm:$0xff] %vm313_vm0, %v270_v37 }
  0x1c   : > { %324 = vst.msk [vmem:[#allocation2 + $0x48] sm:$0x7f] %vm315_vm2, %v268_v33  ;;  %326 = vst.msk [vmem:[#allocation2 + $0x58] sm:$0x7f] %vm315_vm2, %v272_v38  ;;  %v274_v42 = vsel %vm273_vm14, %v197_v34, %v229_v35  ;;  %vm275_vm15 = vcmp.gt.s32.totalorder %v198_v36, %v230_v39  ;;  %vm277_vm1 = vcmp.gt.s32.totalorder %v199_v40, %v231_v41  ;;  %v200_v43 = vld [vmem:[%s610_s13 + $0x78] sm:$0x7f] }
  0x1d   : > { %v232_v44 = vld [vmem:[%s610_s13 + $0x79] sm:$0x7f]  ;;  %v201_v45 = vld [vmem:[%s610_s13 + $0x80] sm:$0xff]  ;;  %327 = vst.msk [vmem:[#allocation2 + $0x60] sm:$0xff] %vm313_vm0, %v274_v42  ;;  %v276_v46 = vsel %vm275_vm15, %v198_v36, %v230_v39  ;;  %v278_v47 = vsel %vm277_vm1, %v199_v40, %v231_v41  ;;  %v202_v49 = vld [vmem:[%s610_s13 + $0x88] sm:$0x7f] }
  0x1e   : > { %vm279_vm3 = vcmp.gt.s32.totalorder %v200_v43, %v232_v44  ;;  %v233_v48 = vld [vmem:[%s610_s13 + $0x81] sm:$0xff]  ;;  %v234_v50 = vld [vmem:[%s610_s13 + $0x89] sm:$0x7f]  ;;  %328 = vst.msk [vmem:[#allocation2 + $0x68] sm:$0x7f] %vm315_vm2, %v276_v46  ;;  %v203_v52 = vld [vmem:[%s610_s13 + $0x90] sm:$0xff] }
  0x1f   : > { %329 = vst.msk [vmem:[#allocation2 + $0x70] sm:$0xff] %vm313_vm0, %v278_v47  ;;  %v280_v51 = vsel %vm279_vm3, %v200_v43, %v232_v44  ;;  %vm281_vm4 = vcmp.gt.s32.totalorder %v201_v45, %v233_v48  ;;  %vm283_vm5 = vcmp.gt.s32.totalorder %v202_v49, %v234_v50  ;;  %v235_v53 = vld [vmem:[%s610_s13 + $0x91] sm:$0xff]  ;;  %v236_v57 = vld [vmem:[%s610_s13 + $0x99] sm:$0x7f]  ;;  %v205_v58 = vld [vmem:[%s610_s13 + $0xa0] sm:$0xff] }
  0x20   : > { %v204_v54 = vld [vmem:[%s610_s13 + $0x98] sm:$0x7f]  ;;  %330 = vst.msk [vmem:[#allocation2 + $0x78] sm:$0x7f] %vm315_vm2, %v280_v51  ;;  %v282_v55 = vsel %vm281_vm4, %v201_v45, %v233_v48  ;;  %v284_v56 = vsel %vm283_vm5, %v202_v49, %v234_v50  ;;  %vm285_vm6 = vcmp.gt.s32.totalorder %v203_v52, %v235_v53  ;;  %v237_v59 = vld [vmem:[%s610_s13 + $0xa1] sm:$0xff]  ;;  %v207_v63 = vld [vmem:[%s610_s13 + $0xb0] sm:$0xff] }
  0x21   : > { %331 = vst.msk [vmem:[#allocation2 + $0x80] sm:$0xff] %vm313_vm0, %v282_v55  ;;  %v286_v60 = vsel %vm285_vm6, %v203_v52, %v235_v53  ;;  %vm287_vm7 = vcmp.gt.s32.totalorder %v204_v54, %v236_v57  ;;  %vm289_vm8 = vcmp.gt.s32.totalorder %v205_v58, %v237_v59  ;;  %v206_v61 = vld [vmem:[%s610_s13 + $0xa8] sm:$0x7f]  ;;  %v239_v2 = vld [vmem:[%s610_s13 + $0xb1] sm:$0xff]  ;;  %v240_v4 = vld [vmem:[%s610_s13 + $0xb9] sm:$0x7f] }
  0x22   : > { %332 = vst.msk [vmem:[#allocation2 + $0x88] sm:$0x7f] %vm315_vm2, %v284_v56  ;;  %v238_v62 = vld [vmem:[%s610_s13 + $0xa9] sm:$0x7f]  ;;  %v288_v0 = vsel %vm287_vm7, %v204_v54, %v236_v57  ;;  %v290_v1 = vsel %vm289_vm8, %v205_v58, %v237_v59  ;;  %v208_v3 = vld [vmem:[%s610_s13 + $0xb8] sm:$0x7f]  ;;  %vm293_vm10 = vcmp.gt.s32.totalorder %v207_v63, %v239_v2 }
  0x23   : > { %333 = vst.msk [vmem:[#allocation2 + $0x90] sm:$0xff] %vm313_vm0, %v286_v60  ;;  %vm291_vm9 = vcmp.gt.s32.totalorder %v206_v61, %v238_v62  ;;  %335 = vst.msk [vmem:[#allocation2 + $0xa0] sm:$0xff] %vm313_vm0, %v290_v1  ;;  %vm295_vm11 = vcmp.gt.s32.totalorder %v208_v3, %v240_v4  ;;  %v209_v6 = vld [vmem:[%s610_s13 + $0xc0] sm:$0xff]  ;;  %v210_v8 = vld [vmem:[%s610_s13 + $0xc8] sm:$0x7f]  ;;  %v294_v9 = vsel %vm293_vm10, %v207_v63, %v239_v2 }
  0x24   : > { %334 = vst.msk [vmem:[#allocation2 + $0x98] sm:$0x7f] %vm315_vm2, %v288_v0  ;;  %v292_v5 = vsel %vm291_vm9, %v206_v61, %v238_v62  ;;  %v241_v7 = vld [vmem:[%s610_s13 + $0xc1] sm:$0xff]  ;;  %v296_v10 = vsel %vm295_vm11, %v208_v3, %v240_v4  ;;  %v242_v11 = vld [vmem:[%s610_s13 + $0xc9] sm:$0x7f]  ;;  %v211_v12 = vld [vmem:[%s610_s13 + $0xd0] sm:$0xff] }
  0x25   : > { %336 = vst.msk [vmem:[#allocation2 + $0xa8] sm:$0x7f] %vm315_vm2, %v292_v5  ;;  %vm297_vm12 = vcmp.gt.s32.totalorder %v209_v6, %v241_v7  ;;  %v243_v13 = vld [vmem:[%s610_s13 + $0xd1] sm:$0xff]  ;;  %338 = vst.msk [vmem:[#allocation2 + $0xb8] sm:$0x7f] %vm315_vm2, %v296_v10  ;;  %vm299_vm13 = vcmp.gt.s32.totalorder %v210_v8, %v242_v11  ;;  %v213_v17 = vld [vmem:[%s610_s13 + $0xe0] sm:$0xff] }
  0x26   : > { %337 = vst.msk [vmem:[#allocation2 + $0xb0] sm:$0xff] %vm313_vm0, %v294_v9  ;;  %v298_v14 = vsel %vm297_vm12, %v209_v6, %v241_v7  ;;  %vm301_vm14 = vcmp.gt.s32.totalorder %v211_v12, %v243_v13  ;;  %v212_v15 = vld [vmem:[%s610_s13 + $0xd8] sm:$0x7f]  ;;  %v300_v18 = vsel %vm299_vm13, %v210_v8, %v242_v11  ;;  %v245_v20 = vld [vmem:[%s610_s13 + $0xe1] sm:$0xff]  ;;  %v246_v22 = vld [vmem:[%s610_s13 + $0xe9] sm:$0x7f] }
  0x27   : > { %v244_v16 = vld [vmem:[%s610_s13 + $0xd9] sm:$0x7f]  ;;  %339 = vst.msk [vmem:[#allocation2 + $0xc0] sm:$0xff] %vm313_vm0, %v298_v14  ;;  %v302_v19 = vsel %vm301_vm14, %v211_v12, %v243_v13  ;;  %v214_v21 = vld [vmem:[%s610_s13 + $0xe8] sm:$0x7f]  ;;  %vm305_vm1 = vcmp.gt.s32.totalorder %v213_v17, %v245_v20  ;;  %v215_v24 = vld [vmem:[%s610_s13 + $0xf0] sm:$0xff] }
  0x28   : > { %vm303_vm15 = vcmp.gt.s32.totalorder %v212_v15, %v244_v16  ;;  %340 = vst.msk [vmem:[#allocation2 + $0xc8] sm:$0x7f] %vm315_vm2, %v300_v18  ;;  %vm307_vm3 = vcmp.gt.s32.totalorder %v214_v21, %v246_v22  ;;  %v247_v25 = vld [vmem:[%s610_s13 + $0xf1] sm:$0xff]  ;;  %v306_v27 = vsel %vm305_vm1, %v213_v17, %v245_v20  ;;  %v248_v29 = vld [vmem:[%s610_s13 + $0xf9] sm:$0x7f] }
  0x29   : > { %341 = vst.msk [vmem:[#allocation2 + $0xd0] sm:$0xff] %vm313_vm0, %v302_v19  ;;  %v304_v23 = vsel %vm303_vm15, %v212_v15, %v244_v16  ;;  %v216_v26 = vld [vmem:[%s610_s13 + $0xf8] sm:$0x7f]  ;;  %v308_v28 = vsel %vm307_vm3, %v214_v21, %v246_v22  ;;  %vm309_vm4 = vcmp.gt.s32.totalorder %v215_v24, %v247_v25  ;;  %v347_v30 = vld [vmem:[#allocation2] ss:$2 sm:$0xff]  ;;  %343 = vst.msk [vmem:[#allocation2 + $0xe0] sm:$0xff] %vm313_vm0, %v306_v27 }
  0x2a   : > { %342 = vst.msk [vmem:[#allocation2 + $0xd8] sm:$0x7f] %vm315_vm2, %v304_v23  ;;  %v363_v31 = vld [vmem:[#allocation2 + $0x10] ss:$2 sm:$0xff]  ;;  %344 = vst.msk [vmem:[#allocation2 + $0xe8] sm:$0x7f] %vm315_vm2, %v308_v28  ;;  %v310_v32 = vsel %vm309_vm4, %v215_v24, %v247_v25  ;;  %vm311_vm5 = vcmp.gt.s32.totalorder %v216_v26, %v248_v29 }
  0x2b   : > { %vm378_vm6 = vcmp.gt.s32.totalorder %v347_v30, %v363_v31  ;;  %v349_v33 = vld [vmem:[#allocation2 + $0x20] ss:$2 sm:$0xff]  ;;  %v365_v34 = vld [vmem:[#allocation2 + $0x30] ss:$2 sm:$0xff]  ;;  %345 = vst.msk [vmem:[#allocation2 + $0xf0] sm:$0xff] %vm313_vm0, %v310_v32  ;;  %v312_v36 = vsel %vm311_vm5, %v216_v26, %v248_v29 }
  0x2c   : > { %v351_v35 = vld [vmem:[#allocation2 + $0x40] ss:$2 sm:$0xff]  ;;  %v379_v37 = vsel %vm378_vm6, %v347_v30, %v363_v31  ;;  %vm380_vm7 = vcmp.gt.s32.totalorder %v349_v33, %v365_v34  ;;  %v367_v38 = vld [vmem:[#allocation2 + $0x50] ss:$2 sm:$0xff]  ;;  %346 = vst.msk [vmem:[#allocation2 + $0xf8] sm:$0x7f] %vm315_vm2, %v312_v36 }
  0x2d   : > { %v353_v39 = vld [vmem:[#allocation2 + $0x60] ss:$2 sm:$0xff]  ;;  %v369_v40 = vld [vmem:[#allocation2 + $0x70] ss:$2 sm:$0xff]  ;;  %394 = vst.msk [vmem:[%s708_s17] sm:$0xff] %vm313_vm0, %v379_v37  ;;  %v381_v41 = vsel %vm380_vm7, %v349_v33, %v365_v34  ;;  %vm382_vm8 = vcmp.gt.s32.totalorder %v351_v35, %v367_v38 }
  0x2e   : > { %vm384_vm9 = vcmp.gt.s32.totalorder %v353_v39, %v369_v40  ;;  %v355_v42 = vld [vmem:[#allocation2 + $0x80] ss:$2 sm:$0xff]  ;;  %v371_v43 = vld [vmem:[#allocation2 + $0x90] ss:$2 sm:$0xff]  ;;  %395 = vst.msk [vmem:[%s708_s17 + $0x8] sm:$0xff] %vm313_vm0, %v381_v41  ;;  %v383_v45 = vsel %vm382_vm8, %v351_v35, %v367_v38 }
  0x2f   : > { %v357_v44 = vld [vmem:[#allocation2 + $0xa0] ss:$2 sm:$0xff]  ;;  %v385_v46 = vsel %vm384_vm9, %v353_v39, %v369_v40  ;;  %vm386_vm10 = vcmp.gt.s32.totalorder %v355_v42, %v371_v43  ;;  %v373_v47 = vld [vmem:[#allocation2 + $0xb0] ss:$2 sm:$0xff]  ;;  %396 = vst.msk [vmem:[%s708_s17 + $0x10] sm:$0xff] %vm313_vm0, %v383_v45 }
  0x30   : > { %397 = vst.msk [vmem:[%s708_s17 + $0x18] sm:$0xff] %vm313_vm0, %v385_v46  ;;  %v387_v48 = vsel %vm386_vm10, %v355_v42, %v371_v43  ;;  %vm388_vm2 = vcmp.gt.s32.totalorder %v357_v44, %v373_v47  ;;  %v359_v50 = vld [vmem:[#allocation2 + $0xc0] ss:$2 sm:$0xff] }
  0x31   : > { %398 = vst.msk [vmem:[%s708_s17 + $0x20] sm:$0xff] %vm313_vm0, %v387_v48  ;;  %v389_v49 = vsel %vm388_vm2, %v357_v44, %v373_v47  ;;  %v375_v51 = vld [vmem:[#allocation2 + $0xd0] ss:$2 sm:$0xff]  ;;  %v361_v52 = vld [vmem:[#allocation2 + $0xe0] ss:$2 sm:$0xff] }
  0x32   : > { %399 = vst.msk [vmem:[%s708_s17 + $0x28] sm:$0xff] %vm313_vm0, %v389_v49  ;;  %vm390_vm11 = vcmp.gt.s32.totalorder %v359_v50, %v375_v51 }
  0x33   : > { %v391_v53 = vsel %vm390_vm11, %v359_v50, %v375_v51  ;;  %v377_v54 = vld [vmem:[#allocation2 + $0xf0] ss:$2 sm:$0xff] }
  0x34   : > { %400 = vst.msk [vmem:[%s708_s17 + $0x30] sm:$0xff] %vm313_vm0, %v391_v53  ;;  %vm392_vm12 = vcmp.gt.s32.totalorder %v361_v52, %v377_v54 }
  0x35   : > { %v393_v55 = vsel %vm392_vm12, %v361_v52, %v377_v54 }
  0x36   : > { %401 = vst.msk [vmem:[%s708_s17 + $0x38] sm:$0xff] %vm313_vm0, %v393_v55 }
  0x37 PF: > { %s11_s8 = sadd.s32 1, %s574_s8   ;;  %s741_s6 = smov %s570_s7 }
  0x38   : > { %p8_p5 = scmp.ge.s32.totalorder %s11_s8, 4   ;;  %s742_s7 = smov %s744_s9 }
  0x3a   :  { %10 = sbr.rel (!%p8_p5) target bundleno = 2 (0x2), region = 69 }

</bundles_post_ra>
